<compile_context>
chip_gen: v6e
topology: v6e:2x2x1
jax: 0.10.0
libtpu: 0.0.40
codegen_flags: <defaults>
</compile_context>

<pallas_src>
import jax
import jax.numpy as jnp
from jax.experimental import pallas as pl
from jax.experimental.pallas import tpu as pltpu


def _round_up(x, m):
    return (x + m - 1) // m * m


# ----------------------------------------------------------------------------
# Kernel 1: generic tiled  y = x @ w + b  with a fully parallel 2D grid.
# Used for (a) the input-to-gates projection and (b) the vocab head.
# ----------------------------------------------------------------------------
def _matmul_bias_kernel(x_ref, w_ref, b_ref, o_ref):
    o_ref[...] = (jnp.dot(x_ref[...], w_ref[...],
                          preferred_element_type=jnp.float32)
                  + b_ref[...]).astype(o_ref.dtype)


def pallas_linear(x, w_t, b, *, tm=256, tn=512):
    """x: (M, K) f32, w_t: (K, N) f32, b: (N,) f32.  K and N multiples of 128."""
    M, K = x.shape
    N = w_t.shape[1]

    tm = min(tm, _round_up(M, 8))
    tn = min(tn, N)
    if N % tn != 0:
        tn = N
    M_pad = _round_up(M, tm)
    if M_pad != M:
        x = jnp.pad(x, ((0, M_pad - M), (0, 0)))

    out = pl.pallas_call(
        _matmul_bias_kernel,
        out_shape=jax.ShapeDtypeStruct((M_pad, N), jnp.float32),
        grid_spec=pltpu.PrefetchScalarGridSpec(
            num_scalar_prefetch=0,
            grid=(M_pad // tm, N // tn),
            in_specs=[
                pl.BlockSpec((tm, K), lambda i, j: (i, 0)),   # x tile
                pl.BlockSpec((K, tn), lambda i, j: (0, j)),   # weight tile
                pl.BlockSpec((1, tn), lambda i, j: (0, j)),   # bias tile
            ],
            out_specs=pl.BlockSpec((tm, tn), lambda i, j: (i, j)),
        ),
        compiler_params=pltpu.CompilerParams(
            dimension_semantics=("parallel", "parallel")),
    )(x, w_t, b.reshape(1, N))
    return out[:M]


# ----------------------------------------------------------------------------
# Kernel 2: the LSTM recurrence.  One grid step == TT time steps.
# gates_t = pre_gates_t + h_{t-1} @ W_hh^T   (bias already fused into pre_gates).
# ----------------------------------------------------------------------------
def lstm_recurrence_kernel(pg_ref, whh_ref, hs_ref, h_sc, c_sc):
    H = h_sc.shape[-1]          # padded hidden size (multiple of 128)
    TT = pg_ref.shape[0]        # time steps per grid iteration

    @pl.when(pl.program_id(0) == 0)
    def _():
        h_sc[...] = jnp.zeros_like(h_sc)
        c_sc[...] = jnp.zeros_like(c_sc)

    def step(tt, carry):
        h_prev = h_sc[...]
        c_prev = c_sc[...]
        gates = pg_ref[tt] + jnp.dot(h_prev, whh_ref[...],
                                     preferred_element_type=jnp.float32)
        # PyTorch LSTM gate order: i, f, g, o (lane-aligned H-wide slices)
        i_g = jax.nn.sigmoid(gates[:, 0 * H:1 * H])
        f_g = jax.nn.sigmoid(gates[:, 1 * H:2 * H])
        g_g = jnp.tanh(gates[:, 2 * H:3 * H])
        o_g = jax.nn.sigmoid(gates[:, 3 * H:4 * H])
        c_new = f_g * c_prev + i_g * g_g
        h_new = o_g * jnp.tanh(c_new)
        c_sc[...] = c_new
        h_sc[...] = h_new
        hs_ref[tt] = h_new
        return carry

    jax.lax.fori_loop(0, TT, step, 0, unroll=True)


def lstm_recurrence(pre_gates, whh_t, *, tt_block):
    """pre_gates: (T_pad, B_pad, 4*H_pad), whh_t: (H_pad, 4*H_pad) -> hs (T_pad, B_pad, H_pad)."""
    T_pad, B_pad, G = pre_gates.shape
    H_pad = whh_t.shape[0]
    return pl.pallas_call(
        lstm_recurrence_kernel,
        out_shape=jax.ShapeDtypeStruct((T_pad, B_pad, H_pad), jnp.float32),
        grid_spec=pltpu.PrefetchScalarGridSpec(
            num_scalar_prefetch=0,
            grid=(T_pad // tt_block,),
            in_specs=[
                pl.BlockSpec((tt_block, B_pad, G), lambda tb: (tb, 0, 0)),  # pre-gates block
                pl.BlockSpec((H_pad, G), lambda tb: (0, 0)),                # W_hh^T (resident)
            ],
            out_specs=pl.BlockSpec((tt_block, B_pad, H_pad), lambda tb: (tb, 0, 0)),
            scratch_shapes=[
                pltpu.VMEM((B_pad, H_pad), jnp.float32),   # h carry
                pltpu.VMEM((B_pad, H_pad), jnp.float32),   # c carry
            ],
        ),
        compiler_params=pltpu.CompilerParams(
            dimension_semantics=("arbitrary",)),    # sequential recurrence over time blocks
    )(pre_gates, whh_t)


# ----------------------------------------------------------------------------
# Forward pass equivalent to DecoderRNN.forward(features, captions)
# ----------------------------------------------------------------------------
def decoder_rnn_forward(features, captions, params, *, tt_block=8):
    """features: (B, E) f32, captions: (B, L) int32  ->  logits (B, L, V) f32."""
    emb_table = params["embedding"]                                   # (V, E)
    V, E = emb_table.shape
    H = params["w_hh"].shape[1]
    B = features.shape[0]

    # Embedding gather + step-0 image feature (plain-JAX glue).
    embeds = jnp.take(emb_table, captions[:, :-1], axis=0)            # (B, L-1, E)
    lstm_in = jnp.concatenate([features[:, None, :], embeds], axis=1)  # (B, T, E)
    T = lstm_in.shape[1]

    # Padded sizes: sublane-aligned batch, lane-aligned feature dims.
    E_pad = _round_up(E, 128)
    H_pad = _round_up(H, 128)
    V_pad = _round_up(V, 128)
    B_pad = _round_up(B, 8)
    T_pad = _round_up(T, tt_block)

    # Time-major, padded input.
    x = jnp.transpose(lstm_in, (1, 0, 2)).astype(jnp.float32)         # (T, B, E)
    x = jnp.pad(x, ((0, T_pad - T), (0, B_pad - B), (0, E_pad - E)))  # (T_pad, B_pad, E_pad)

    # Pad weights; each gate block is placed at a lane-aligned H_pad stride.
    def pad_gate_rows(w, in_dim, in_pad):          # (4H, in_dim) -> (4*H_pad, in_pad)
        w = w.astype(jnp.float32).reshape(4, H, in_dim)
        w = jnp.pad(w, ((0, 0), (0, H_pad - H), (0, in_pad - in_dim)))
        return w.reshape(4 * H_pad, in_pad)

    wih_pad = pad_gate_rows(params["w_ih"], E, E_pad)                 # (4H_pad, E_pad)
    whh_pad = pad_gate_rows(params["w_hh"], H, H_pad)                 # (4H_pad, H_pad)
    b_fused = (params["b_ih"] + params["b_hh"]).astype(jnp.float32).reshape(4, H)
    b_fused = jnp.pad(b_fused, ((0, 0), (0, H_pad - H))).reshape(4 * H_pad)
    wout_pad = jnp.pad(params["w_out"].astype(jnp.float32),
                       ((0, V_pad - V), (0, H_pad - H)))              # (V_pad, H_pad)
    bout_pad = jnp.pad(params["b_out"].astype(jnp.float32), (0, V_pad - V))

    # (1) Input-to-gates projection + fused bias: one big PARALLEL matmul.
    pre_gates = pallas_linear(x.reshape(T_pad * B_pad, E_pad),
                              jnp.transpose(wih_pad), b_fused)        # (T_pad*B_pad, 4H_pad)
    pre_gates = pre_gates.reshape(T_pad, B_pad, 4 * H_pad)

    # (2) Sequential LSTM recurrence: only h @ W_hh^T per step, TT steps per grid iter.
    hs = lstm_recurrence(pre_gates, jnp.transpose(whh_pad), tt_block=tt_block)

    # (3) Vocab head hoisted out of the recurrence: one big PARALLEL matmul.
    logits = pallas_linear(hs.reshape(T_pad * B_pad, H_pad),
                           jnp.transpose(wout_pad), bout_pad)         # (T_pad*B_pad, V_pad)
    logits = logits.reshape(T_pad, B_pad, V_pad)[:T, :B, :V]
    return jnp.transpose(logits, (1, 0, 2))                           # (B, T, V), batch_first


# ----------------------------------------------------------------------------
# Pure-JAX reference matching PyTorch nn.LSTM + nn.Linear semantics.
# ----------------------------------------------------------------------------
def decoder_rnn_reference(features, captions, params):
    emb_table = params["embedding"]
    embeds = jnp.take(emb_table, captions[:, :-1], axis=0)
    x = jnp.concatenate([features[:, None, :], embeds], axis=1)       # (B, T, E)
    B, T, E = x.shape
    H = params["w_hh"].shape[1]

    def step(carry, x_t):
        h, c = carry
        gates = (x_t @ params["w_ih"].T + params["b_ih"]
                 + h @ params["w_hh"].T + params["b_hh"])
        i = jax.nn.sigmoid(gates[:, 0 * H:1 * H])
        f = jax.nn.sigmoid(gates[:, 1 * H:2 * H])
        g = jnp.tanh(gates[:, 2 * H:3 * H])
        o = jax.nn.sigmoid(gates[:, 3 * H:4 * H])
        c = f * c + i * g
        h = o * jnp.tanh(c)
        return (h, c), h

    h0 = jnp.zeros((B, H), jnp.float32)
    c0 = jnp.zeros((B, H), jnp.float32)
    (_, _), hs = jax.lax.scan(step, (h0, c0), jnp.transpose(x, (1, 0, 2)))
    hs = jnp.transpose(hs, (1, 0, 2))                                 # (B, T, H)
    return hs @ params["w_out"].T + params["b_out"]


def init_params(key, vocab_size, embed_size, hidden_size):
    ks = jax.random.split(key, 7)
    s = 0.1
    return {
        "embedding": s * jax.random.normal(ks[0], (vocab_size, embed_size), jnp.float32),
        "w_ih": s * jax.random.normal(ks[1], (4 * hidden_size, embed_size), jnp.float32),
        "w_hh": s * jax.random.normal(ks[2], (4 * hidden_size, hidden_size), jnp.float32),
        "b_ih": s * jax.random.normal(ks[3], (4 * hidden_size,), jnp.float32),
        "b_hh": s * jax.random.normal(ks[4], (4 * hidden_size,), jnp.float32),
        "w_out": s * jax.random.normal(ks[5], (vocab_size, hidden_size), jnp.float32),
        "b_out": s * jax.random.normal(ks[6], (vocab_size,), jnp.float32),
    }


if __name__ == "__main__":
    B, E, H, V, L = 2, 32, 32, 64, 8   # batch, embed, hidden, vocab, caption length

    key = jax.random.PRNGKey(0)
    k_par, k_feat, k_cap = jax.random.split(key, 3)

    params = init_params(k_par, V, E, H)
    features = jax.random.normal(k_feat, (B, E), jnp.float32)
    captions = jax.random.randint(k_cap, (B, L), 0, V, jnp.int32)

    out = jax.block_until_ready(decoder_rnn_forward(features, captions, params))
    ref = decoder_rnn_reference(features, captions, params)

    assert out.shape == (B, L, V), out.shape
    err = float(jnp.max(jnp.abs(out - ref)))
    assert jnp.allclose(out, ref, atol=1e-4, rtol=1e-4), err

    print("KERNEL_OK")
</pallas_src>

<mosaic_0001>
module attributes {stable_mosaic.version = 11 : i64} {
  func.func @_matmul_bias_kernel(%arg0: i32, %arg1: i32, %arg2: memref<64x128xf32, #tpu.memory_space<vmem>>, %arg3: memref<128x512xf32, #tpu.memory_space<vmem>>, %arg4: memref<1x512xf32, #tpu.memory_space<vmem>>, %arg5: memref<64x512xf32, #tpu.memory_space<vmem>>) attributes {dimension_semantics = [#tpu.dimension_semantics<parallel>, #tpu.dimension_semantics<parallel>], iteration_bounds = array<i64: 1, 1>, scalar_prefetch = 0 : i64, scratch_operands = 0 : i64, tpu.core_type = #tpu.core_type<tc>, window_params = [{transform_indices = @transform_0, window_bounds = array<i64: 64, 128>}, {transform_indices = @transform_1, window_bounds = array<i64: 128, 512>}, {transform_indices = @transform_2, window_bounds = array<i64: 1, 512>}, {transform_indices = @transform_3, window_bounds = array<i64: 64, 512>}]} {
    %c0 = arith.constant 0 : index
    %c0_0 = arith.constant 0 : index
    %0 = vector.load %arg2[%c0, %c0_0] : memref<64x128xf32, #tpu.memory_space<vmem>>, vector<64x128xf32>
    %c0_1 = arith.constant 0 : index
    %c0_2 = arith.constant 0 : index
    %1 = vector.load %arg3[%c0_1, %c0_2] : memref<128x512xf32, #tpu.memory_space<vmem>>, vector<128x512xf32>
    %cst = arith.constant dense<0.000000e+00> : vector<64x512xf32>
    %2 = tpu.matmul %0, %1, %cst {dimension_numbers = #tpu.dot_dimension_numbers<[1], [0], [0], [1], [0, 0, 1, 1], [], []>} : vector<64x128xf32>, vector<128x512xf32>, vector<64x512xf32> -> vector<64x512xf32>
    %c0_3 = arith.constant 0 : index
    %c0_4 = arith.constant 0 : index
    %3 = vector.load %arg4[%c0_3, %c0_4] : memref<1x512xf32, #tpu.memory_space<vmem>>, vector<1x512xf32>
    %4 = vector.broadcast %3 : vector<1x512xf32> to vector<64x512xf32>
    %5 = arith.addf %2, %4 : vector<64x512xf32>
    %c0_5 = arith.constant 0 : index
    %c0_6 = arith.constant 0 : index
    %6 = vector.load %arg5[%c0_5, %c0_6] : memref<64x512xf32, #tpu.memory_space<vmem>>, vector<64x512xf32>
    tpu.vector_store %arg5[%c0_5, %c0_6], %5 {strides = array<i32>} : memref<64x512xf32, #tpu.memory_space<vmem>>, vector<64x512xf32>,
    return
  }
  func.func @transform_0(%arg0: i32, %arg1: i32) -> (i32, i32) {
    %c0_i32 = arith.constant 0 : i32
    %c0_i32_0 = arith.constant 0 : i32
    return %arg0, %c0_i32 : i32, i32
  }
  func.func @transform_1(%arg0: i32, %arg1: i32) -> (i32, i32) {
    %c0_i32 = arith.constant 0 : i32
    %c0_i32_0 = arith.constant 0 : i32
    return %c0_i32, %arg1 : i32, i32
  }
  func.func @transform_2(%arg0: i32, %arg1: i32) -> (i32, i32) {
    %c0_i32 = arith.constant 0 : i32
    %c0_i32_0 = arith.constant 0 : i32
    return %c0_i32, %arg1 : i32, i32
  }
  func.func @transform_3(%arg0: i32, %arg1: i32) -> (i32, i32) {
    %c0_i32 = arith.constant 0 : i32
    return %arg0, %arg1 : i32, i32
  }
}

</mosaic_0001>

<bundles_post_ra>
// kernel: tpu_custom_call.1
= control target key start
LH: loop header
LB: loop body
LE: loop exit
PB: predicated region body
PF: predicated region fallthrough
CT: control target
= control target key end

     0   :  { %8 = vsyncpa [#allocation3], 0  ;;  %s622_s0 = inlined_call_operand.hbm [shape: f32[64,128], index: 0, kind: input, shape index: {}]   ;;  %s623_s1 = inlined_call_operand.hbm [shape: f32[128,512], index: 1, kind: input, shape index: {}]   ;;  %s624_s2 = inlined_call_operand.hbm [shape: f32[1,512], index: 2, kind: input, shape index: {}]   ;;  %s625_s3 = inlined_call_operand.hbm [shape: f32[64,512], index: 3, kind: output, shape index: {}]  }
   0x1   :  { %9 = vsyncpa [#allocation6], 0 }
   0x2   :  { %10 = vsyncpa [#allocation4], 0  ;;  %s519_s12 = smov [#allocation5]  }
   0x3   :  { %s28_s13 = sshll.u32 %s519_s12, 4  ;;  %s29_s13 = int_to_ptr.vmem [resolvable:$true] %s28_s13 }
   0x4   :  { %s441_s14 = scalar_lea.vmem %s29_s13, 8192  ;;  %p446_p1 = scmp.lt.s32.totalorder %s29_s13, %s29_s13 }
   0x5   :  { %p442_p0 = scmp.ne.s32.totalorder %s29_s13, %s441_s14  ;;  %p447_p2 = scmp.lt.s32.totalorder %s441_s14, %s441_s14 }
   0x7   :  { %p448_p3 = por %p447_p2, %p446_p1 }
   0x9   :  { %p449_p4 = pnand %p448_p3, %p442_p0 }
   0xb   :  { %452 = shalt.err (!%p449_p4)
}
   0xc   :  { %s520_s15 = smov 512   ;;  %s521_s16 = smov 32  }
   0xd   :  { %34 = dma.hbm_to_vmem [thread:$0]  %s623_s1, 8192, %s29_s13, [#allocation6], %s520_s15, %s520_s15, %s521_s16  }
   0xe   :  { %s522_s19 = smov [#allocation2]  }
   0xf   :  { %s16_s20 = sshll.u32 %s522_s19, 4  ;;  %s17_s20 = int_to_ptr.vmem [resolvable:$true] %s16_s20 }
  0x10   :  { %s461_s21 = scalar_lea.vmem %s17_s20, 1024  ;;  %p466_p6 = scmp.lt.s32.totalorder %s17_s20, %s17_s20 }
  0x11   :  { %p462_p5 = scmp.ne.s32.totalorder %s17_s20, %s461_s21  ;;  %p467_p7 = scmp.lt.s32.totalorder %s461_s21, %s461_s21 }
  0x13   :  { %p468_p8 = por %p467_p7, %p466_p6 }
  0x15   :  { %p469_p9 = pnand %p468_p8, %p462_p5 }
  0x17   :  { %472 = shalt.err (!%p469_p9)
}
  0x18   :  { %s523_s22 = smov 128   ;;  %s524_s23 = smov 8  }
  0x19   :  { %22 = dma.hbm_to_vmem [thread:$0]  %s622_s0, 1024, %s17_s20, [#allocation3], %s523_s22, %s523_s22, %s524_s23  }
  0x1a   :  { %s525_s26 = smov [#allocation7]  }
  0x1b   :  { %s41_s27 = sshll.u32 %s525_s26, 4  ;;  %s42_s27 = int_to_ptr.vmem [resolvable:$true] %s41_s27 }
  0x1c   :  { %s481_s1 = scalar_lea.vmem %s42_s27, 64  ;;  %p486_p11 = scmp.lt.s32.totalorder %s42_s27, %s42_s27 }
  0x1d   :  { %p482_p10 = scmp.ne.s32.totalorder %s42_s27, %s481_s1  ;;  %p487_p12 = scmp.lt.s32.totalorder %s481_s1, %s481_s1 }
  0x1f   :  { %p488_p13 = por %p487_p12, %p486_p11 }
  0x21   :  { %p489_p0 = pnand %p488_p13, %p482_p10 }
  0x23   :  { %492 = shalt.err (!%p489_p0)
}
  0x24   :  { %44 = dma.hbm_to_vmem [thread:$0]  %s624_s2, 64, %s42_s27, [#allocation6]  }
  0x25   :  { %513 = dma.done.wait [#allocation3], 1024  }
  0x26   :  { %514 = vsyncadd [#allocation3], 4294966272 }
  0x27   :  { %515 = dma.done.wait [#allocation6], 8256  }
  0x28   :  { %516 = vsyncadd [#allocation6], 4294959040  ;;  %v526_v0 = vmov 0.0   ;;  %v123_v1 = vld [vmem:[#allocation5 + $0x1e8] sm:$0xff]  ;;  %v125_v2 = vld [vmem:[#allocation5 + $0x1f8] sm:$0xff]  ;;  %s527_s0 = smov [#allocation8]  }
  0x29   :  { %212 = vmatprep.mubr.f32.mxu0 %v526_v0  ;;  %325 = vmatprep.mubr.f32.mxu1 %v526_v0  ;;  %v122_v3 = vld [vmem:[#allocation5 + $0x1e0] sm:$0xff]  ;;  %v124_v4 = vld [vmem:[#allocation5 + $0x1f0] sm:$0xff]  ;;  %v119_v5 = vld [vmem:[#allocation5 + $0x1c8] sm:$0xff]  ;;  %s411_s2 = sshll.u32 %s527_s0, 4  ;;  %s412_s2 = int_to_ptr.vmem [resolvable:$true] %s411_s2 }
  0x2a   :  { %148 = vmatprep.subr.mxu0 %v123_v1  ;;  %261 = vmatprep.subr.mxu1 %v125_v2  ;;  %v121_v6 = vld [vmem:[#allocation5 + $0x1d8] sm:$0xff]  ;;  %v118_v7 = vld [vmem:[#allocation5 + $0x1c0] sm:$0xff]  ;;  %v120_v8 = vld [vmem:[#allocation5 + $0x1d0] sm:$0xff]  ;;  %s493_s30 = scalar_lea.vmem %s412_s2, 4096  ;;  %p498_p2 = scmp.lt.s32.totalorder %s412_s2, %s412_s2 }
  0x2b   :  { %149 = vmatpush1.msra.mxu0 %v122_v3  ;;  %262 = vmatpush1.msra.mxu1 %v124_v4  ;;  %v115_v9 = vld [vmem:[#allocation5 + $0x1a8] sm:$0xff]  ;;  %v117_v10 = vld [vmem:[#allocation5 + $0x1b8] sm:$0xff]  ;;  %v114_v11 = vld [vmem:[#allocation5 + $0x1a0] sm:$0xff]  ;;  %p494_p1 = scmp.ne.s32.totalorder %s412_s2, %s493_s30  ;;  %p499_p3 = scmp.lt.s32.totalorder %s493_s30, %s493_s30 }
  0x2c   :  { %150 = vmatprep.subr.mxu0 %v119_v5  ;;  %263 = vmatprep.subr.mxu1 %v121_v6  ;;  %v116_v12 = vld [vmem:[#allocation5 + $0x1b0] sm:$0xff]  ;;  %v111_v13 = vld [vmem:[#allocation5 + $0x188] sm:$0xff]  ;;  %v113_v14 = vld [vmem:[#allocation5 + $0x198] sm:$0xff] }
  0x2d   :  { %151 = vmatpush1.msra.mxu0 %v118_v7  ;;  %264 = vmatpush1.msra.mxu1 %v120_v8  ;;  %v110_v15 = vld [vmem:[#allocation5 + $0x180] sm:$0xff]  ;;  %v112_v16 = vld [vmem:[#allocation5 + $0x190] sm:$0xff]  ;;  %v107_v17 = vld [vmem:[#allocation5 + $0x168] sm:$0xff]  ;;  %p500_p4 = por %p499_p3, %p498_p2 }
  0x2e   :  { %152 = vmatprep.subr.mxu0 %v115_v9  ;;  %265 = vmatprep.subr.mxu1 %v117_v10  ;;  %v109_v18 = vld [vmem:[#allocation5 + $0x178] sm:$0xff]  ;;  %v106_v19 = vld [vmem:[#allocation5 + $0x160] sm:$0xff]  ;;  %v108_v20 = vld [vmem:[#allocation5 + $0x170] sm:$0xff]  ;;  %v128_v10 = vlaneseq }
  0x2f   :  { %153 = vmatpush1.msra.mxu0 %v114_v11  ;;  %266 = vmatpush1.msra.mxu1 %v116_v12  ;;  %v103_v21 = vld [vmem:[#allocation5 + $0x148] sm:$0xff]  ;;  %v105_v22 = vld [vmem:[#allocation5 + $0x158] sm:$0xff]  ;;  %v102_v23 = vld [vmem:[#allocation5 + $0x140] sm:$0xff]  ;;  %p501_p5 = pnand %p500_p4, %p494_p1 }
  0x30   :  { %154 = vmatprep.subr.mxu0 %v111_v13  ;;  %267 = vmatprep.subr.mxu1 %v113_v14  ;;  %v104_v24 = vld [vmem:[#allocation5 + $0x150] sm:$0xff]  ;;  %v99_v25 = vld [vmem:[#allocation5 + $0x128] sm:$0xff]  ;;  %v101_v26 = vld [vmem:[#allocation5 + $0x138] sm:$0xff]  ;;  %v129_v11 = vshrl.u32 %v128_v10, 7 }
  0x31   :  { %155 = vmatpush1.msra.mxu0 %v110_v15  ;;  %268 = vmatpush1.msra.mxu1 %v112_v16  ;;  %v98_v27 = vld [vmem:[#allocation5 + $0x120] sm:$0xff]  ;;  %v100_v28 = vld [vmem:[#allocation5 + $0x130] sm:$0xff]  ;;  %v95_v29 = vld [vmem:[#allocation5 + $0x108] sm:$0xff] }
  0x32   :  { %156 = vmatprep.subr.mxu0 %v107_v17  ;;  %269 = vmatprep.subr.mxu1 %v109_v18  ;;  %v97_v30 = vld [vmem:[#allocation5 + $0x118] sm:$0xff]  ;;  %v94_v31 = vld [vmem:[#allocation5 + $0x100] sm:$0xff]  ;;  %v96_v32 = vld [vmem:[#allocation5 + $0x110] sm:$0xff]  ;;  %v130_v12 = vsub.s32 0, %v129_v11  ;;  %v138_v13 = vsub.s32 2, %v129_v11  ;;  %v134_v15 = vsub.s32 1, %v129_v11 }
  0x33   :  { %157 = vmatpush1.msra.mxu0 %v106_v19  ;;  %270 = vmatpush1.msra.mxu1 %v108_v20  ;;  %v91_v33 = vld [vmem:[#allocation5 + $0xe8] sm:$0xff]  ;;  %v93_v34 = vld [vmem:[#allocation5 + $0xf8] sm:$0xff]  ;;  %v90_v35 = vld [vmem:[#allocation5 + $0xe0] sm:$0xff]  ;;  %v142_v16 = vsub.s32 3, %v129_v11 }
  0x34   :  { %158 = vmatprep.subr.mxu0 %v103_v21  ;;  %271 = vmatprep.subr.mxu1 %v105_v22  ;;  %v92_v36 = vld [vmem:[#allocation5 + $0xf0] sm:$0xff]  ;;  %v87_v37 = vld [vmem:[#allocation5 + $0xc8] sm:$0xff]  ;;  %v89_v38 = vld [vmem:[#allocation5 + $0xd8] sm:$0xff] }
  0x35   :  { %159 = vmatpush1.msra.mxu0 %v102_v23  ;;  %272 = vmatpush1.msra.mxu1 %v104_v24  ;;  %v86_v39 = vld [vmem:[#allocation5 + $0xc0] sm:$0xff]  ;;  %v88_v40 = vld [vmem:[#allocation5 + $0xd0] sm:$0xff]  ;;  %v83_v41 = vld [vmem:[#allocation5 + $0xa8] sm:$0xff] }
  0x36   :  { %160 = vmatprep.subr.mxu0 %v99_v25  ;;  %273 = vmatprep.subr.mxu1 %v101_v26  ;;  %v85_v42 = vld [vmem:[#allocation5 + $0xb8] sm:$0xff]  ;;  %v82_v43 = vld [vmem:[#allocation5 + $0xa0] sm:$0xff]  ;;  %v84_v44 = vld [vmem:[#allocation5 + $0xb0] sm:$0xff] }
  0x37   :  { %161 = vmatpush1.msra.mxu0 %v98_v27  ;;  %274 = vmatpush1.msra.mxu1 %v100_v28  ;;  %v79_v45 = vld [vmem:[#allocation5 + $0x88] sm:$0xff]  ;;  %v81_v46 = vld [vmem:[#allocation5 + $0x98] sm:$0xff]  ;;  %v78_v47 = vld [vmem:[#allocation5 + $0x80] sm:$0xff] }
  0x38   :  { %162 = vmatprep.subr.mxu0 %v95_v29  ;;  %275 = vmatprep.subr.mxu1 %v97_v30  ;;  %v80_v48 = vld [vmem:[#allocation5 + $0x90] sm:$0xff]  ;;  %v75_v49 = vld [vmem:[#allocation5 + $0x68] sm:$0xff]  ;;  %v77_v50 = vld [vmem:[#allocation5 + $0x78] sm:$0xff] }
  0x39   :  { %163 = vmatpush1.msra.mxu0 %v94_v31  ;;  %276 = vmatpush1.msra.mxu1 %v96_v32  ;;  %v74_v51 = vld [vmem:[#allocation5 + $0x60] sm:$0xff]  ;;  %v76_v52 = vld [vmem:[#allocation5 + $0x70] sm:$0xff]  ;;  %v71_v53 = vld [vmem:[#allocation5 + $0x48] sm:$0xff] }
  0x3a   :  { %164 = vmatprep.subr.mxu0 %v91_v33  ;;  %277 = vmatprep.subr.mxu1 %v93_v34  ;;  %v73_v54 = vld [vmem:[#allocation5 + $0x58] sm:$0xff]  ;;  %v70_v55 = vld [vmem:[#allocation5 + $0x40] sm:$0xff]  ;;  %v72_v56 = vld [vmem:[#allocation5 + $0x50] sm:$0xff] }
  0x3b   :  { %165 = vmatpush1.msra.mxu0 %v90_v35  ;;  %278 = vmatpush1.msra.mxu1 %v92_v36  ;;  %v67_v57 = vld [vmem:[#allocation5 + $0x28] sm:$0xff]  ;;  %v69_v58 = vld [vmem:[#allocation5 + $0x38] sm:$0xff]  ;;  %v66_v59 = vld [vmem:[#allocation5 + $0x20] sm:$0xff] }
  0x3c   :  { %166 = vmatprep.subr.mxu0 %v87_v37  ;;  %279 = vmatprep.subr.mxu1 %v89_v38  ;;  %v68_v60 = vld [vmem:[#allocation5 + $0x30] sm:$0xff]  ;;  %v63_v61 = vld [vmem:[#allocation5 + $0x8] sm:$0xff]  ;;  %v65_v62 = vld [vmem:[#allocation5 + $0x18] sm:$0xff] }
  0x3d   :  { %167 = vmatpush1.msra.mxu0 %v86_v39  ;;  %280 = vmatpush1.msra.mxu1 %v88_v40  ;;  %v62_v63 = vld [vmem:[#allocation5] sm:$0xff]  ;;  %v64_v1 = vld [vmem:[#allocation5 + $0x10] sm:$0xff]  ;;  %v55_v3 = vld [vmem:[#allocation2 + $0x8] sm:$0xff] }
  0x3e   :  { %168 = vmatprep.subr.mxu0 %v83_v41  ;;  %281 = vmatprep.subr.mxu1 %v85_v42  ;;  %v54_v2 = vld [vmem:[#allocation2] sm:$0xff]  ;;  %v56_v4 = vld [vmem:[#allocation2 + $0x10] sm:$0xff]  ;;  %v57_v5 = vld [vmem:[#allocation2 + $0x18] sm:$0xff] }
  0x3f   :  { %169 = vmatpush1.msra.mxu0 %v82_v43  ;;  %282 = vmatpush1.msra.mxu1 %v84_v44  ;;  %v58_v6 = vld [vmem:[#allocation2 + $0x20] sm:$0xff]  ;;  %v59_v7 = vld [vmem:[#allocation2 + $0x28] sm:$0xff]  ;;  %v60_v8 = vld [vmem:[#allocation2 + $0x30] sm:$0xff] }
  0x40   :  { %170 = vmatprep.subr.mxu0 %v79_v45  ;;  %283 = vmatprep.subr.mxu1 %v81_v46  ;;  %v61_v9 = vld [vmem:[#allocation2 + $0x38] sm:$0xff]  ;;  %v126_v14 = vld [vmem:[#allocation7] sm:$0xf] }
  0x41   :  { %171 = vmatpush1.msra.mxu0 %v78_v47  ;;  %284 = vmatpush1.msra.mxu1 %v80_v48  ;;  %v576_v17 = vrot.slane %v126_v14, %v130_v12  ;;  %v578_v18 = vrot.slane %v126_v14, %v138_v13  ;;  %v580_v19 = vrot.slane %v126_v14, %v134_v15 }
  0x42   :  { %172 = vmatprep.subr.mxu0 %v75_v49  ;;  %285 = vmatprep.subr.mxu1 %v77_v50  ;;  %v582_v20 = vrot.slane %v126_v14, %v142_v16 }
  0x43   :  { %173 = vmatpush1.msra.mxu0 %v74_v51  ;;  %286 = vmatpush1.msra.mxu1 %v76_v52 }
  0x44   :  { %174 = vmatprep.subr.mxu0 %v71_v53  ;;  %287 = vmatprep.subr.mxu1 %v73_v54 }
  0x45   :  { %175 = vmatpush1.msra.mxu0 %v70_v55  ;;  %288 = vmatpush1.msra.mxu1 %v72_v56 }
  0x46   :  { %176 = vmatprep.subr.mxu0 %v67_v57  ;;  %289 = vmatprep.subr.mxu1 %v69_v58 }
  0x47   :  { %177 = vmatpush1.msra.mxu0 %v66_v59  ;;  %290 = vmatpush1.msra.mxu1 %v68_v60 }
  0x48   :  { %178 = vmatprep.subr.mxu0 %v63_v61  ;;  %291 = vmatprep.subr.mxu1 %v65_v62 }
  0x49   :  { %179 = vmatpush1.msra.mxu0 %v62_v63  ;;  %292 = vmatpush1.msra.mxu1 %v64_v1 }
  0x4a   :  { %213 = vmatmul.mubr.f32.vlgmr.msra.gmra.mxu0 %v54_v2  ;;  %326 = vmatmul.mubr.f32.vlgmr.msra.gmra.mxu1 %v54_v2 }
  0x4b   :  { %218 = vmatprep.mubr.f32.mxu0 %v526_v0  ;;  %331 = vmatprep.mubr.f32.mxu1 %v526_v0 }
  0x4e   :  { %219 = vmatmul.mubr.f32.gmra.mxu0 %v55_v3  ;;  %332 = vmatmul.mubr.f32.gmra.mxu1 %v55_v3 }
  0x4f   :  { %224 = vmatprep.mubr.f32.mxu0 %v526_v0  ;;  %337 = vmatprep.mubr.f32.mxu1 %v526_v0 }
  0x52   :  { %225 = vmatmul.mubr.f32.gmra.mxu0 %v56_v4  ;;  %338 = vmatmul.mubr.f32.gmra.mxu1 %v56_v4 }
  0x53   :  { %230 = vmatprep.mubr.f32.mxu0 %v526_v0  ;;  %343 = vmatprep.mubr.f32.mxu1 %v526_v0 }
  0x56   :  { %231 = vmatmul.mubr.f32.gmra.mxu0 %v57_v5  ;;  %344 = vmatmul.mubr.f32.gmra.mxu1 %v57_v5 }
  0x57   :  { %236 = vmatprep.mubr.f32.mxu0 %v526_v0  ;;  %349 = vmatprep.mubr.f32.mxu1 %v526_v0 }
  0x5a   :  { %237 = vmatmul.mubr.f32.gmra.mxu0 %v58_v6  ;;  %350 = vmatmul.mubr.f32.gmra.mxu1 %v58_v6 }
  0x5b   :  { %242 = vmatprep.mubr.f32.mxu0 %v526_v0  ;;  %355 = vmatprep.mubr.f32.mxu1 %v526_v0 }
  0x5e   :  { %243 = vmatmul.mubr.f32.gmra.mxu0 %v59_v7  ;;  %356 = vmatmul.mubr.f32.gmra.mxu1 %v59_v7 }
  0x5f   :  { %248 = vmatprep.mubr.f32.mxu0 %v526_v0  ;;  %361 = vmatprep.mubr.f32.mxu1 %v526_v0 }
  0x62   :  { %249 = vmatmul.mubr.f32.gmra.mxu0 %v60_v8  ;;  %362 = vmatmul.mubr.f32.gmra.mxu1 %v60_v8 }
  0x63   :  { %254 = vmatprep.mubr.f32.mxu0 %v526_v0  ;;  %367 = vmatprep.mubr.f32.mxu1 %v526_v0 }
  0x66   :  { %255 = vmatmul.mubr.f32.gmra.mxu0 %v61_v9  ;;  %368 = vmatmul.mubr.f32.gmra.mxu1 %v61_v9 }
 0x10a   :  { %v214_v21 = vpop.f32.mrf.mxu0  ;;  %v327_v0 = vpop.f32.mrf.mxu1 }
 0x10b   :  { %v215_v22 = vadd.f32 %v214_v21, %v576_v17  ;;  %v328_v23 = vadd.f32 %v327_v0, %v578_v18 }
 0x10c   :  { %v216_v24 = vpop.f32.mrf.mxu0  ;;  %v329_v25 = vpop.f32.mrf.mxu1 }
 0x10d   :  { %374 = vst [vmem:[#allocation8] sm:$0xff] %v215_v22  ;;  %376 = vst [vmem:[#allocation8 + $0x10] sm:$0xff] %v328_v23  ;;  %v217_v26 = vadd.f32 %v216_v24, %v580_v19  ;;  %v330_v27 = vadd.f32 %v329_v25, %v582_v20 }
 0x10e   :  { %v220_v28 = vpop.f32.mrf.mxu0  ;;  %v333_v29 = vpop.f32.mrf.mxu1 }
 0x10f   :  { %375 = vst [vmem:[#allocation8 + $0x8] sm:$0xff] %v217_v26  ;;  %377 = vst [vmem:[#allocation8 + $0x18] sm:$0xff] %v330_v27  ;;  %v221_v30 = vadd.f32 %v220_v28, %v576_v17  ;;  %v334_v31 = vadd.f32 %v333_v29, %v578_v18 }
 0x110   :  { %v222_v32 = vpop.f32.mrf.mxu0  ;;  %v335_v33 = vpop.f32.mrf.mxu1 }
 0x111   :  { %378 = vst [vmem:[#allocation8 + $0x20] sm:$0xff] %v221_v30  ;;  %380 = vst [vmem:[#allocation8 + $0x30] sm:$0xff] %v334_v31  ;;  %v223_v34 = vadd.f32 %v222_v32, %v580_v19  ;;  %v336_v35 = vadd.f32 %v335_v33, %v582_v20 }
 0x112   :  { %v226_v36 = vpop.f32.mrf.mxu0  ;;  %v339_v37 = vpop.f32.mrf.mxu1 }
 0x113   :  { %379 = vst [vmem:[#allocation8 + $0x28] sm:$0xff] %v223_v34  ;;  %381 = vst [vmem:[#allocation8 + $0x38] sm:$0xff] %v336_v35  ;;  %v227_v38 = vadd.f32 %v226_v36, %v576_v17  ;;  %v340_v39 = vadd.f32 %v339_v37, %v578_v18 }
 0x114   :  { %v228_v40 = vpop.f32.mrf.mxu0  ;;  %v341_v41 = vpop.f32.mrf.mxu1 }
 0x115   :  { %382 = vst [vmem:[#allocation8 + $0x40] sm:$0xff] %v227_v38  ;;  %384 = vst [vmem:[#allocation8 + $0x50] sm:$0xff] %v340_v39  ;;  %v229_v42 = vadd.f32 %v228_v40, %v580_v19  ;;  %v342_v43 = vadd.f32 %v341_v41, %v582_v20 }
 0x116   :  { %v232_v44 = vpop.f32.mrf.mxu0  ;;  %v345_v45 = vpop.f32.mrf.mxu1 }
 0x117   :  { %383 = vst [vmem:[#allocation8 + $0x48] sm:$0xff] %v229_v42  ;;  %385 = vst [vmem:[#allocation8 + $0x58] sm:$0xff] %v342_v43  ;;  %v233_v46 = vadd.f32 %v232_v44, %v576_v17  ;;  %v346_v47 = vadd.f32 %v345_v45, %v578_v18 }
 0x118   :  { %v234_v48 = vpop.f32.mrf.mxu0  ;;  %v347_v49 = vpop.f32.mrf.mxu1 }
 0x119   :  { %386 = vst [vmem:[#allocation8 + $0x60] sm:$0xff] %v233_v46  ;;  %388 = vst [vmem:[#allocation8 + $0x70] sm:$0xff] %v346_v47  ;;  %v235_v50 = vadd.f32 %v234_v48, %v580_v19  ;;  %v348_v51 = vadd.f32 %v347_v49, %v582_v20 }
 0x11a   :  { %v238_v52 = vpop.f32.mrf.mxu0  ;;  %v351_v53 = vpop.f32.mrf.mxu1 }
 0x11b   :  { %387 = vst [vmem:[#allocation8 + $0x68] sm:$0xff] %v235_v50  ;;  %389 = vst [vmem:[#allocation8 + $0x78] sm:$0xff] %v348_v51  ;;  %v239_v54 = vadd.f32 %v238_v52, %v576_v17  ;;  %v352_v55 = vadd.f32 %v351_v53, %v578_v18 }
 0x11c   :  { %v240_v56 = vpop.f32.mrf.mxu0  ;;  %v353_v57 = vpop.f32.mrf.mxu1 }
 0x11d   :  { %390 = vst [vmem:[#allocation8 + $0x80] sm:$0xff] %v239_v54  ;;  %392 = vst [vmem:[#allocation8 + $0x90] sm:$0xff] %v352_v55  ;;  %v241_v58 = vadd.f32 %v240_v56, %v580_v19  ;;  %v354_v59 = vadd.f32 %v353_v57, %v582_v20 }
 0x11e   :  { %v244_v60 = vpop.f32.mrf.mxu0  ;;  %v357_v61 = vpop.f32.mrf.mxu1 }
 0x11f   :  { %391 = vst [vmem:[#allocation8 + $0x88] sm:$0xff] %v241_v58  ;;  %393 = vst [vmem:[#allocation8 + $0x98] sm:$0xff] %v354_v59  ;;  %v245_v62 = vadd.f32 %v244_v60, %v576_v17  ;;  %v358_v63 = vadd.f32 %v357_v61, %v578_v18 }
 0x120   :  { %v246_v1 = vpop.f32.mrf.mxu0  ;;  %v359_v2 = vpop.f32.mrf.mxu1 }
 0x121   :  { %394 = vst [vmem:[#allocation8 + $0xa0] sm:$0xff] %v245_v62  ;;  %396 = vst [vmem:[#allocation8 + $0xb0] sm:$0xff] %v358_v63  ;;  %v247_v3 = vadd.f32 %v246_v1, %v580_v19  ;;  %v360_v4 = vadd.f32 %v359_v2, %v582_v20 }
 0x122   :  { %v250_v5 = vpop.f32.mrf.mxu0  ;;  %v363_v6 = vpop.f32.mrf.mxu1 }
 0x123   :  { %395 = vst [vmem:[#allocation8 + $0xa8] sm:$0xff] %v247_v3  ;;  %397 = vst [vmem:[#allocation8 + $0xb8] sm:$0xff] %v360_v4  ;;  %v251_v7 = vadd.f32 %v250_v5, %v576_v17  ;;  %v364_v8 = vadd.f32 %v363_v6, %v578_v18 }
 0x124   :  { %v252_v9 = vpop.f32.mrf.mxu0  ;;  %v365_v10 = vpop.f32.mrf.mxu1 }
 0x125   :  { %398 = vst [vmem:[#allocation8 + $0xc0] sm:$0xff] %v251_v7  ;;  %400 = vst [vmem:[#allocation8 + $0xd0] sm:$0xff] %v364_v8  ;;  %v253_v11 = vadd.f32 %v252_v9, %v580_v19  ;;  %v366_v12 = vadd.f32 %v365_v10, %v582_v20 }
 0x126   :  { %v256_v13 = vpop.f32.mrf.mxu0  ;;  %v369_v14 = vpop.f32.mrf.mxu1 }
 0x127   :  { %399 = vst [vmem:[#allocation8 + $0xc8] sm:$0xff] %v253_v11  ;;  %401 = vst [vmem:[#allocation8 + $0xd8] sm:$0xff] %v366_v12  ;;  %v257_v15 = vadd.f32 %v256_v13, %v576_v17  ;;  %v370_v16 = vadd.f32 %v369_v14, %v578_v18 }
 0x128   :  { %v258_v21 = vpop.f32.mrf.mxu0  ;;  %v371_v0 = vpop.f32.mrf.mxu1 }
 0x129   :  { %402 = vst [vmem:[#allocation8 + $0xe0] sm:$0xff] %v257_v15  ;;  %404 = vst [vmem:[#allocation8 + $0xf0] sm:$0xff] %v370_v16  ;;  %v259_v22 = vadd.f32 %v258_v21, %v580_v19  ;;  %v372_v23 = vadd.f32 %v371_v0, %v582_v20 }
 0x12b   :  { %403 = vst [vmem:[#allocation8 + $0xe8] sm:$0xff] %v259_v22  ;;  %405 = vst [vmem:[#allocation8 + $0xf8] sm:$0xff] %v372_v23 }
 0x12c   :  { %504 = shalt.err (!%p501_p5)
}
 0x12d   :  { %417 = dma.vmem_to_hbm [thread:$0]  %s412_s2, 4096, %s625_s3, [#allocation4], %s520_s15, %s520_s15, %s521_s16  }
 0x12e   :  { %517 = dma.done.wait [#allocation4], 4096  }
 0x12f   :  { %518 = vsyncadd [#allocation4], 4294963200 }
 0x130   :  { %421 = vsyncpa [#allocation3], 1 }
 0x131   :  { %422 = vsyncpa [#allocation6], 1 }
 0x132   :  { %423 = vsyncpa [#allocation4], 1 }

</bundles_post_ra>
